<compile_context>
chip_gen: v6e
topology: v6e:2x2x1
jax: 0.10.0
libtpu: 0.0.40
codegen_flags: <defaults>
</compile_context>

<pallas_src>
import numpy as np

import jax
import jax.numpy as jnp
from jax.experimental import pallas as pl
from jax.experimental.pallas import tpu as pltpu


def _stochastic_depth_kernel(x_ref, m_ref, o_ref):
    """One (row_block, col_block) tile: out = x * per-row mask (lane broadcast)."""
    o_ref[...] = x_ref[...] * m_ref[...]


def stochastic_depth(x, drop_prob, *, training=False, seed=0):
    """Stochastic-depth forward. x: (B, ...) array; the drop is applied per batch row."""
    if not training:
        return x  # eval path is an exact identity; no kernel launch needed

    orig_shape = x.shape
    B = orig_shape[0]
    D = int(np.prod(orig_shape[1:])) if len(orig_shape) > 1 else 1
    x2 = x.reshape(B, D)

    # Per-row Bernoulli(keep_prob) mask, computed once outside the hot loop.
    # floor(keep_prob + u) == 1  <=>  u >= drop_prob   for u in [0, 1).
    u = jax.random.uniform(jax.random.PRNGKey(seed), (B, 1), jnp.float32)
    mask = (u >= jnp.float32(drop_prob)).astype(x.dtype)          # (B, 1) of {0, 1}

    # Mem-bound elementwise op: fixed, bounded tiles + cdiv grid (Pallas masks the
    # ragged last tile).  256 x 4096 f32 blocks are 4 MiB each; in + out double
    # buffered is ~16 MiB, well inside the explicit 48 MiB VMEM limit on every
    # generation (v7x physical VMEM is 64 MiB).
    row_block = min(B, 256)       # 256 is a multiple of 32 -> sublane-aligned for all dtypes
    col_block = min(D, 4096)      # full D or a multiple of 128 -> lane-dense stores
    grid = (pl.cdiv(B, row_block), pl.cdiv(D, col_block))

    # v7x has 2 TensorCores: a (1,1) grid would leave one idle, so split the feature
    # axis into >=2 lane-dense tiles when possible.
    if grid[0] * grid[1] == 1 and D > 128:
        col_block = ((pl.cdiv(D, 2) + 127) // 128) * 128
        grid = (1, pl.cdiv(D, col_block))

    out = pl.pallas_call(
        _stochastic_depth_kernel,
        grid=grid,
        in_specs=[
            pl.BlockSpec((row_block, col_block), lambda i, j: (i, j)),
            pl.BlockSpec((row_block, 1), lambda i, j: (i, 0)),
        ],
        out_specs=pl.BlockSpec((row_block, col_block), lambda i, j: (i, j)),
        out_shape=jax.ShapeDtypeStruct((B, D), x.dtype),
        compiler_params=pltpu.CompilerParams(
            dimension_semantics=("parallel", "parallel"),
            vmem_limit_bytes=48 * 1024 * 1024,
        ),
    )(x2, mask)
    return out.reshape(orig_shape)


if __name__ == "__main__":
    B, C, H, W = 2, 4, 16, 16
    x = jax.random.normal(jax.random.PRNGKey(0), (B, C, H, W), jnp.float32)

    # Eval path: exact identity.
    y_eval = stochastic_depth(x, 0.5, training=False)
    assert jnp.array_equal(y_eval, x)

    # Training, drop_prob = 0.0 -> mask = 1 for every row -> exact identity.
    y_keep = jax.block_until_ready(stochastic_depth(x, 0.0, training=True, seed=0))
    assert jnp.array_equal(y_keep, x)

    # Training, drop_prob = 1.0 -> mask = 0 for every row -> exact zeros.
    y_drop = jax.block_until_ready(stochastic_depth(x, 1.0, training=True, seed=0))
    assert jnp.array_equal(y_drop, jnp.zeros_like(x))

    # Training, drop_prob = 0.5 -> every batch row is either kept exactly or zeroed.
    y = jax.block_until_ready(stochastic_depth(x, 0.5, training=True, seed=123))
    xb, yb = x.reshape(B, -1), y.reshape(B, -1)
    for b in range(B):
        row_kept = bool(jnp.array_equal(yb[b], xb[b]))
        row_dropped = bool(jnp.array_equal(yb[b], jnp.zeros_like(yb[b])))
        assert row_kept or row_dropped

    print("KERNEL_OK")
</pallas_src>

<mosaic_0001>
module attributes {stable_mosaic.version = 11 : i64} {
  func.func @_stochastic_depth_kernel(%arg0: i32, %arg1: i32, %arg2: memref<2x512xf32, #tpu.memory_space<vmem>>, %arg3: memref<2x1xf32, #tpu.memory_space<vmem>>, %arg4: memref<2x512xf32, #tpu.memory_space<vmem>>) attributes {dimension_semantics = [#tpu.dimension_semantics<parallel>, #tpu.dimension_semantics<parallel>], iteration_bounds = array<i64: 1, 2>, scalar_prefetch = 0 : i64, scratch_operands = 0 : i64, tpu.core_type = #tpu.core_type<tc>, window_params = [{transform_indices = @transform_0, window_bounds = array<i64: 2, 512>}, {transform_indices = @transform_1, window_bounds = array<i64: 2, 1>}, {transform_indices = @transform_2, window_bounds = array<i64: 2, 512>}]} {
    %c0 = arith.constant 0 : index
    %c0_0 = arith.constant 0 : index
    %0 = vector.load %arg2[%c0, %c0_0] : memref<2x512xf32, #tpu.memory_space<vmem>>, vector<2x512xf32>
    %c0_1 = arith.constant 0 : index
    %c0_2 = arith.constant 0 : index
    %1 = vector.load %arg3[%c0_1, %c0_2] : memref<2x1xf32, #tpu.memory_space<vmem>>, vector<2x1xf32>
    %2 = vector.broadcast %1 : vector<2x1xf32> to vector<2x512xf32>
    %3 = arith.mulf %0, %2 : vector<2x512xf32>
    %c0_3 = arith.constant 0 : index
    %c0_4 = arith.constant 0 : index
    %4 = vector.load %arg4[%c0_3, %c0_4] : memref<2x512xf32, #tpu.memory_space<vmem>>, vector<2x512xf32>
    tpu.vector_store %arg4[%c0_3, %c0_4], %3 {strides = array<i32>} : memref<2x512xf32, #tpu.memory_space<vmem>>, vector<2x512xf32>,
    return
  }
  func.func @transform_0(%arg0: i32, %arg1: i32) -> (i32, i32) {
    %c0_i32 = arith.constant 0 : i32
    return %arg0, %arg1 : i32, i32
  }
  func.func @transform_1(%arg0: i32, %arg1: i32) -> (i32, i32) {
    %c0_i32 = arith.constant 0 : i32
    %c0_i32_0 = arith.constant 0 : i32
    return %arg0, %c0_i32 : i32, i32
  }
  func.func @transform_2(%arg0: i32, %arg1: i32) -> (i32, i32) {
    %c0_i32 = arith.constant 0 : i32
    return %arg0, %arg1 : i32, i32
  }
}

</mosaic_0001>

<bundles_post_ra>
// kernel: tpu_custom_call.1
= control target key start
LH: loop header
LB: loop body
LE: loop exit
PB: predicated region body
PF: predicated region fallthrough
CT: control target
= control target key end

     0   :  { %7 = vsyncpa [#allocation3], 0  ;;  %s678_s0 = inlined_call_operand.hbm [shape: f32[2,1024], index: 0, kind: input, shape index: {}]   ;;  %s679_s1 = inlined_call_operand.vmem [shape: f32[2,1], index: 1, kind: input, shape index: {}]   ;;  %s680_s2 = inlined_call_operand.hbm [shape: f32[2,1024], index: 2, kind: output, shape index: {}]  }
   0x1   :  { %9 = vsyncpa [#allocation3 + $0x1], 0 }
   0x2   :  { %10 = vsyncpa [#allocation4], 0 }
   0x3   :  { %12 = vsyncpa [#allocation4 + $0x1], 0  ;;  %s541_s9 = smov 0   ;;  %s543_s10 = smov 0  }
   0x4   :  { %s545_s11 = smov 0   ;;  %s547_s12 = smov 0  }
   0x5   :  { %s549_s13 = smov 0   ;;  %s551_s14 = smov 0  }
   0x6 LB: > { %s329_s15 = sadd.s32 4294967295, %s520_s14   ;;  %s330_s16 = sadd.s32 4294967294, %s520_s14   ;;  %s520_s14 = sphi %s551_s14, %s18_s14   ;;  %s516_s13 = sphi %s549_s13, %s692_s13   ;;  %s512_s12 = sphi %s547_s12, %s691_s12   ;;  %s508_s11 = sphi %s545_s11, %s690_s11   ;;  %s504_s10 = sphi %s543_s10, %s689_s10   ;;  %s500_s9 = sphi %s541_s9, %s688_s9  }
   0x7   : > { %s27_s17 = sadd.s32 1, %s516_s13  ;;  %s39_s18 = sadd.s32 1, %s508_s11 }
   0x8   : > { %p28_p0 = scmp.ge.s32.totalorder %s27_s17, 2  ;;  %p46_p1 = scmp.ne.s32.totalorder %s508_s11, %s504_s10 }
   0x9   : > { %p47_p2 = scmp.eq.s32.totalorder %s520_s14, 0  ;;  %p52_p3 = scmp.ne.s32.totalorder %s504_s10, %s500_s9 }
   0xa   : > { %s694_s17 = smov (%p28_p0, %s27_s17), 0  ;;  %p53_p5 = scmp.eq.s32.totalorder %s329_s15, 0 }
   0xb   : > { %p582_p4 = por %p47_p2, %p46_p1  ;;  %s35_s20 = ssub.s32 %s516_s13, %s694_s17 }
   0xc   : > { %p104_p6 = scmp.eq.s32.totalorder %s329_s15, 1  ;;  %p37_p7 = scmp.eq.s32.totalorder %s35_s20, 0 }
   0xd   : > { %p588_p8 = por %p53_p5, %p52_p3  ;;  %p110_p10 = scmp.eq.s32.totalorder %s330_s16, 1 }
   0xe   : > { %p592_p9 = por %p104_p6, %p46_p1  ;;  %p359_p13 = scmp.lt.s32.totalorder %s520_s14, 2 }
   0xf   : > { %s597_s23 = scalar_select %p37_p7, %s508_s11, %s39_s18  }
  0x10   : > { %p599_p11 = por %p110_p10, %p52_p3  ;;  %s137_s25 = sand.u32 1, %s508_s11  }
  0x11   : > { %s334_s26 = sshll.u32 %s137_s25, 3  ;;  %s345_s27 = sshll.u32 %s516_s13, 7 }
  0x12   : > { %s684_s24 = scalar_select %p599_p11, 1, 0 }
  0x13   : > { %s149_s30 = scalar_lea.hbm %s678_s0, %s345_s27  ;;  %s141_s3 = scalar_lea.vmem [#allocation2], %s334_s26 }
  0x14   : > { %s151_s4 = sshll.u32 %s141_s3, 4  ;;  %p612_p0 = pnand %p359_p13, %p582_p4  ;;  %s152_s4 = int_to_ptr.vmem [resolvable:$true] %s151_s4 }
  0x15   : > { %p337_p1 = scmp.ge.s32.totalorder %s520_s14, 1  ;;  %p156_p2 = scmp.lt.s32.totalorder %s520_s14, 3 }
  0x16   : > { %s138_s6 = scalar_lea.sflag [#allocation3], %s137_s25  ;;  %p414_p3 = pneg %p612_p0 }
  0x17   : > { %s425_s7 = scalar_lea.vmem %s152_s4, 128  ;;  %s522_s8 = smov [#allocation2]  }
  0x18   : > { %p426_p5 = scmp.ne.s32.totalorder %s152_s4, %s425_s7  ;;  %s430_s15 = sshll.u32 %s522_s8, 4  ;;  %s431_s15 = int_to_ptr.vmem [resolvable:$false] %s430_s15 }
  0x19   : > { %s432_s16 = scalar_lea.vmem %s431_s15, 256  ;;  %p433_p10 = scmp.lt.s32.totalorder %s152_s4, %s431_s15 }
  0x1a   : > { %p428_p6 = pnand %p426_p5, %p414_p3  ;;  %p434_p12 = scmp.lt.s32.totalorder %s432_s16, %s425_s7 }
  0x1c   : > { %p429_p7 = pneg %p428_p6  ;;  %p435_p4 = por %p434_p12, %p433_p10 }
  0x1e   : > { %p436_p13 = pnand %p435_p4, %p429_p7 }
  0x20   : > { %439 = shalt.err (!%p436_p13)
}
  0x21   : > { %354 = dma.hbm_to_vmem [thread:$0]  (!%p612_p0), %s149_s30, 128, %s152_s4, %s138_s6  }
  0x22   : > { %p157_p11 = pnand %p337_p1, %p156_p2 }
  0x23   : > { %s627_s18 = sand.u32 (!%p157_p11), 1, %s504_s10  }
  0x24   : > { %160 = sbr.rel (%p157_p11) target bundleno = 185 (0xb9), region = 28  ;;  %s338_s19 = sshll.u32 (!%p157_p11), %s627_s18, 3 }
  0x25   : > { %s163_s20 = scalar_lea.sflag (!%p157_p11), [#allocation3], %s627_s18  ;;  %s166_s25 = scalar_lea.vmem (!%p157_p11), [#allocation2], %s338_s19 }
  0x29   : > { %491 = dma.done.wait (%p588_p8), %s163_s20, 128  }
  0x2a   : > { %493 = vsyncadd (%p588_p8), %s163_s20, 4294967168  ;;  %v523_v0 = vmov 0   ;;  %v198_v1 = vld [vmem:[%s679_s1] sm:$0x3]  ;;  %v524_v2 = vmov 269488144   ;;  %v206_v4 = vlaneseq }
  0x2b   : > { %411 = vset.pattern.permute.xlu0 %v523_v0  ;;  %v204_v3 = vunpack.c.l.s4 %v524_v2  ;;  %v197_v9 = vld [vmem:[%s166_s25] sm:$0xff]  ;;  %s346_s21 = sshll.u32 %s512_s12, 7  ;;  %s190_s28 = scalar_lea.vmem [#allocation5], %s338_s19 }
  0x2c   : > { %201 = vperm.xlu0 %411, %v198_v1   ;;  %v207_v6 = vshrl.u32 %v206_v4, 7  ;;  %s230_s29 = sshll.u32 %s190_s28, 4  ;;  %s228_s4 = scalar_lea.hbm %s680_s2, %s346_s21  ;;  %s231_s29 = int_to_ptr.vmem [resolvable:$true] %s230_s29 }
  0x2d   : > { %v205_v5 = vunpack.c.0.s8 %v204_v3  ;;  %s214_s5 = scalar_lea.sflag [#allocation4], %s627_s18  ;;  %s440_s6 = scalar_lea.vmem %s231_s29, 128 }
  0x2e   : > { %p441_p8 = scmp.ne.s32.totalorder %s231_s29, %s440_s6  ;;  %s525_s7 = smov [#allocation5]  }
  0x2f   : > { %v208_v7 = vsub.s32 %v205_v5, %v207_v6  ;;  %s444_s8 = sshll.u32 %s525_s7, 4  ;;  %s445_s8 = int_to_ptr.vmem [resolvable:$false] %s444_s8 }
  0x30   : > { %p442_p11 = pnand %p441_p8, %p592_p9  ;;  %s446_s12 = scalar_lea.vmem %s445_s8, 256 }
  0x31   : > { %p447_p0 = scmp.lt.s32.totalorder %s231_s29, %s445_s8  ;;  %p448_p1 = scmp.lt.s32.totalorder %s446_s12, %s440_s6 }
  0x32   : > { %p443_p12 = pneg %p442_p11 }
  0x33   : > { %p449_p2 = por %p448_p1, %p447_p0 }
  0x35   : > { %p450_p3 = pnand %p449_p2, %p443_p12 }
  0xa7   : > { %v202_v8 = vpop.permute.xlu0 %201 }
  0xa8   : > { %v209_v10 = vrot.slane %v202_v8, %v208_v7 }
  0xaa   : > { %v211_v11 = vmul.f32 %v209_v10, %v197_v9 }
  0xac   : > { %212 = vst [vmem:[%s190_s28] sm:$0xff] %v211_v11 }
  0xad   : > { %453 = shalt.err (!%p450_p3)
}
  0xae   : > { %s454_s15 = scalar_lea.hbm %s228_s4, 128  ;;  %s458_s19 = scalar_lea.hbm %s680_s2, 256 }
  0xaf   : > { %p455_p5 = scmp.ne.s32.totalorder %s228_s4, %s454_s15  ;;  %p459_p10 = scmp.lt.s32.totalorder %s228_s4, %s680_s2 }
  0xb0   : > { %p460_p4 = scmp.lt.s32.totalorder %s458_s19, %s454_s15 }
  0xb1   : > { %p456_p6 = pnand %p455_p5, %p592_p9 }
  0xb2   : > { %p461_p13 = por %p460_p4, %p459_p10 }
  0xb3   : > { %p457_p7 = pneg %p456_p6 }
  0xb5   : > { %p462_p8 = pnand %p461_p13, %p457_p7 }
  0xb7   : > { %465 = shalt.err (!%p462_p8)
}
  0xb8   : > { %349 = dma.vmem_to_hbm [thread:$0]  (%p592_p9), %s231_s29, 128, %s228_s4, %s214_s5  }
  0xb9 PF: > { %s242_s26 = sand.u32 1, %s500_s9   ;;  %p686_p11 = scmp.ne.s32.totalorder %s684_s24, 0 }
  0xba   : > { %p687_p12 = scmp.ge.s32.totalorder %s520_s14, 2  ;;  %s243_s27 = scalar_lea.sflag [#allocation4], %s242_s26 }
  0xbc   : > { %p356_p0 = pnand %p687_p12, %p686_p11 }
  0xbe   : > { %p357_p1 = pneg %p356_p0 }
  0xc0   : > { %495 = dma.done.wait (%p357_p1), %s243_s27, 128  }
  0xc1   : > { %497 = vsyncadd (%p357_p1), %s243_s27, 4294967168  ;;  %s18_s14 = sadd.s32 1, %s520_s14   ;;  %s688_s9 = smov %s504_s10 }
  0xc2   : > { %p15_p2 = scmp.ge.s32.totalorder %s18_s14, 4   ;;  %s689_s10 = smov %s508_s11 }
  0xc3   : > { %s690_s11 = smov %s597_s23  ;;  %s691_s12 = smov %s516_s13 }
  0xc4   : > { %s692_s13 = smov %s694_s17  ;;  %17 = sbr.rel (!%p15_p2) target bundleno = 6 (0x6), region = 76 }
  0xc9   :  { %248 = vsyncpa [#allocation3], 1 }
  0xca   :  { %250 = vsyncpa [#allocation3 + $0x1], 1 }
  0xcb   :  { %251 = vsyncpa [#allocation4], 1 }
  0xcc   :  { %253 = vsyncpa [#allocation4 + $0x1], 1 }

</bundles_post_ra>
